<compile_context>
chip_gen: v7x
topology: tpu7x:2x2x1
jax: 0.10.0
libtpu: 0.0.40
codegen_flags: <defaults>
</compile_context>

<pallas_src>
import functools

import jax
import jax.numpy as jnp
from jax.experimental import pallas as pl
from jax.experimental.pallas import tpu as pltpu


def _cdc_kernel(x_ref, w_ref, o_ref, *, W, B_N):
    # x_ref: (B_N, C_in, H*W)   NCHW images flattened over (H, W)
    # w_ref: (5, C_out, C_in)   taps [up, left, center(theta-folded), right, down]
    # o_ref: (B_N, C_out, H*W)
    hw = x_ref.shape[-1]

    # Row/column validity masks from the flattened pixel index (in-kernel,
    # no HBM mask stream; also works per-tile if HW is ever tiled).
    idx = jax.lax.broadcasted_iota(jnp.int32, (1, hw), 1)
    col = idx % W
    left_ok = col != 0             # x[i, j-1] exists
    right_ok = col != (W - 1)      # x[i, j+1] exists
    top_ok = idx >= W              # x[i-1, j] exists
    bot_ok = idx < (hw - W)        # x[i+1, j] exists

    w_up = w_ref[0]
    w_left = w_ref[1]
    w_center = w_ref[2]
    w_right = w_ref[3]
    w_down = w_ref[4]

    def one_image(b, carry):
        x = x_ref[b]                                     # (C_in, HW)
        zero = jnp.zeros((), x.dtype)

        # Shifted neighbour slabs via lane rotation (XLU slot, no VMEM copy);
        # the selects realize the conv's zero padding and stop the rolls from
        # wrapping across image rows / the image boundary.
        up = jnp.where(top_ok, pltpu.roll(x, shift=W, axis=1), zero)
        left = jnp.where(left_ok, pltpu.roll(x, shift=1, axis=1), zero)
        right = jnp.where(right_ok, pltpu.roll(x, shift=hw - 1, axis=1), zero)
        down = jnp.where(bot_ok, pltpu.roll(x, shift=hw - W, axis=1), zero)

        # Five small accumulating MXU contractions (C_out, C_in)x(C_in, HW);
        # avoids materializing a stacked (5*C_in, HW) buffer.
        acc = jnp.dot(w_center, x, preferred_element_type=jnp.float32)
        acc = acc + jnp.dot(w_up, up, preferred_element_type=jnp.float32)
        acc = acc + jnp.dot(w_left, left, preferred_element_type=jnp.float32)
        acc = acc + jnp.dot(w_right, right, preferred_element_type=jnp.float32)
        acc = acc + jnp.dot(w_down, down, preferred_element_type=jnp.float32)

        o_ref[b] = acc.astype(o_ref.dtype)               # lane-dense (HW) store
        return carry

    jax.lax.fori_loop(0, B_N, one_image, None, unroll=True)


def conv2d_hori_veri_cross(x_nchw, weight, theta=0.7, compute_dtype=jnp.bfloat16):
    """x_nchw: (N, C_in, H, W); weight: (C_out, C_in, 1, 5).

    Returns (N, C_out, H, W), matching the PyTorch module (bias=False,
    stride=1, padding=1, dilation=1, groups=1).

    compute_dtype: dtype inputs/weights are streamed in (default bf16: the
    kernel is HBM-bandwidth bound, so halving bytes ~ halves wall-clock).
    Accumulation is always f32 and the output keeps x's dtype.  Pass
    compute_dtype=jnp.float32 (or None) for tight numerics.
    """
    N, C_in, H, W = x_nchw.shape
    C_out = weight.shape[0]
    out_dtype = x_nchw.dtype
    hw = H * W

    theta = float(theta)
    if abs(theta) < 1e-8:          # matches the torch early-return branch
        theta = 0.0

    # Taps in torch order [w0..w4] = [up, left, center, right, down]; fold
    # theta into the centre tap (exact: the 1x1 "diff" kernel is sum(w)
    # applied to the centre pixel).
    w5 = weight[:, :, 0, :].astype(jnp.float32)                # (C_out, C_in, 5)
    w_sum = jnp.sum(w5, axis=-1)                               # (C_out, C_in)
    taps = jnp.stack(
        [w5[..., 0], w5[..., 1], w5[..., 2] - theta * w_sum,
         w5[..., 3], w5[..., 4]], axis=0)                      # (5, C_out, C_in)

    cdt = jnp.dtype(out_dtype) if compute_dtype is None else jnp.dtype(compute_dtype)
    x_flat = x_nchw.reshape(N, C_in, hw).astype(cdt)           # metadata-only reshape
    taps = taps.astype(cdt)

    itemsize = cdt.itemsize
    out_itemsize = jnp.dtype(out_dtype).itemsize

    # Batch tiling: aim for >= ~512 KiB input blocks, but keep >= 2 grid
    # steps when N >= 2 so both v7x TensorCores get work.
    per_image_bytes = max(1, C_in * hw * itemsize)
    bn_cap = max(1, (512 * 1024) // per_image_bytes)
    if N >= 2:
        bn_cap = min(bn_cap, N // 2)
    bn_cap = int(min(max(bn_cap, 1), N))
    B_N = max(d for d in range(1, bn_cap + 1) if N % d == 0)
    grid = (N // B_N,)

    # VMEM budget: double-buffered in/out blocks + weights + in-kernel
    # temporaries (4 rolled slabs + f32 accumulator), with headroom.
    in_block = B_N * C_in * hw * itemsize
    out_block = B_N * C_out * hw * out_itemsize
    w_block = 5 * C_out * C_in * itemsize
    temporaries = (4 * C_in * itemsize + 4 * C_out + 8) * hw
    needed = 2 * (in_block + out_block + w_block) + temporaries + (2 << 20)
    vmem_limit = int(min(max(needed, 32 * 1024 * 1024), 64 * 1024 * 1024))

    cost = pl.CostEstimate(
        flops=2 * N * hw * 5 * C_in * C_out,
        transcendentals=0,
        bytes_accessed=(N * C_in * hw + 5 * C_out * C_in) * itemsize
        + N * C_out * hw * out_itemsize,
    )

    out_flat = pl.pallas_call(
        functools.partial(_cdc_kernel, W=W, B_N=B_N),
        out_shape=jax.ShapeDtypeStruct((N, C_out, hw), out_dtype),
        grid=grid,
        in_specs=[
            pl.BlockSpec((B_N, C_in, hw), lambda n: (n, 0, 0)),
            pl.BlockSpec((5, C_out, C_in), lambda n: (0, 0, 0)),
        ],
        out_specs=pl.BlockSpec((B_N, C_out, hw), lambda n: (n, 0, 0)),
        compiler_params=pltpu.CompilerParams(
            dimension_semantics=("parallel",),
            vmem_limit_bytes=vmem_limit),
        cost_estimate=cost,
    )(x_flat, taps)

    return out_flat.reshape(N, C_out, H, W)      # metadata-only reshape


def _reference(x, weight, theta):
    """Pure-JAX f32 reference reproducing the torch forward exactly."""
    C_out, C_in = weight.shape[0], weight.shape[1]
    w5 = weight[:, :, 0, :]
    k = jnp.zeros((C_out, C_in, 3, 3), jnp.float32)
    k = k.at[:, :, 0, 1].set(w5[..., 0])
    k = k.at[:, :, 1, 0].set(w5[..., 1])
    k = k.at[:, :, 1, 1].set(w5[..., 2])
    k = k.at[:, :, 1, 2].set(w5[..., 3])
    k = k.at[:, :, 2, 1].set(w5[..., 4])
    dn = ("NCHW", "OIHW", "NCHW")
    out_normal = jax.lax.conv_general_dilated(
        x, k, (1, 1), ((1, 1), (1, 1)), dimension_numbers=dn,
        precision=jax.lax.Precision.HIGHEST)
    kd = jnp.sum(w5, axis=-1)[:, :, None, None]
    out_diff = jax.lax.conv_general_dilated(
        x, kd, (1, 1), ((0, 0), (0, 0)), dimension_numbers=dn,
        precision=jax.lax.Precision.HIGHEST)
    return out_normal - theta * out_diff


if __name__ == "__main__":
    # Deterministic synthetic parameters / inputs (no checkpoint load).
    key = jax.random.PRNGKey(0)
    k_x, k_w = jax.random.split(key)

    N, C_in, C_out, H, W = 2, 4, 8, 16, 16
    theta = 0.7

    x = jax.random.normal(k_x, (N, C_in, H, W), dtype=jnp.float32)
    # nn.Conv2d weight shape: (C_out, C_in, 1, 5); deterministic init.
    weight = 0.1 * jax.random.normal(k_w, (C_out, C_in, 1, 5), dtype=jnp.float32)

    ref = _reference(x, weight, theta)

    # f32 streaming path: tight check against the conv reference.
    out_f32 = conv2d_hori_veri_cross(x, weight, theta=theta,
                                     compute_dtype=jnp.float32)
    jax.block_until_ready(out_f32)
    assert out_f32.shape == (N, C_out, H, W), out_f32.shape
    err = float(jnp.max(jnp.abs(out_f32 - ref)))
    assert jnp.allclose(out_f32, ref, rtol=1e-4, atol=1e-4), err

    # Default bf16 streaming path (memory-bound -> ~2x less HBM traffic);
    # looser tolerance only because inputs/weights are cast to bf16.
    out_bf16 = conv2d_hori_veri_cross(x, weight, theta=theta)
    jax.block_until_ready(out_bf16)
    assert out_bf16.shape == (N, C_out, H, W), out_bf16.shape
    err_bf = float(jnp.max(jnp.abs(out_bf16 - ref)))
    assert jnp.allclose(out_bf16, ref, rtol=5e-2, atol=6e-2), err_bf

    print("KERNEL_OK")
</pallas_src>

<mosaic_0001>
module attributes {stable_mosaic.version = 11 : i64} {
  func.func @_cdc_kernel(%arg0: i32, %arg1: memref<1x4x256xf32, #tpu.memory_space<vmem>>, %arg2: memref<5x8x4xf32, #tpu.memory_space<vmem>>, %arg3: memref<1x8x256xf32, #tpu.memory_space<vmem>>) attributes {dimension_semantics = [#tpu.dimension_semantics<parallel>], iteration_bounds = array<i64: 2>, scalar_prefetch = 0 : i64, scratch_operands = 0 : i64, tpu.core_type = #tpu.core_type<tc>, window_params = [{transform_indices = @transform_0, window_bounds = array<i64: 1, 4, 256>}, {pipeline_mode = #tpu.pipeline_mode<synchronous>, transform_indices = @transform_1, window_bounds = array<i64: 5, 8, 4>}, {transform_indices = @transform_2, window_bounds = array<i64: 1, 8, 256>}]} {
    %0 = tpu.iota {dimensions = array<i32: 1>} : vector<1x256xi32>
    %c16_i32 = arith.constant 16 : i32
    %c0_i32 = arith.constant 0 : i32
    %1 = arith.cmpi eq, %c16_i32, %c0_i32 : i32
    %c1_i32 = arith.constant 1 : i32
    %2 = arith.select %1, %c1_i32, %c16_i32 : i32
    %3 = vector.broadcast %2 : i32 to vector<1x256xi32>
    %4 = arith.remsi %0, %3 : vector<1x256xi32>
    %c0_i32_0 = arith.constant 0 : i32
    %5 = vector.broadcast %c0_i32_0 : i32 to vector<1x256xi32>
    %6 = arith.cmpi ne, %4, %5 : vector<1x256xi32>
    %c0_i32_1 = arith.constant 0 : i32
    %7 = vector.broadcast %c0_i32_1 : i32 to vector<1x256xi32>
    %8 = arith.cmpi slt, %4, %7 : vector<1x256xi32>
    %c0_i32_2 = arith.constant 0 : i32
    %9 = arith.cmpi slt, %2, %c0_i32_2 : i32
    %10 = vector.broadcast %9 : i1 to vector<1x256xi1>
    %11 = vector.broadcast %10 : vector<1x256xi1> to vector<1x256xi1>
    %12 = arith.xori %8, %11 : vector<1x256xi1>
    %13 = arith.andi %12, %6 : vector<1x256xi1>
    %14 = vector.broadcast %2 : i32 to vector<1x256xi32>
    %15 = arith.addi %4, %14 : vector<1x256xi32>
    %16 = arith.select %13, %15, %4 : vector<1x256xi1>, vector<1x256xi32>
    %c0_i32_3 = arith.constant 0 : i32
    %17 = vector.broadcast %c0_i32_3 : i32 to vector<1x256xi32>
    %18 = arith.cmpi ne, %16, %17 : vector<1x256xi32>
    %c15_i32 = arith.constant 15 : i32
    %19 = vector.broadcast %c15_i32 : i32 to vector<1x256xi32>
    %20 = arith.cmpi ne, %16, %19 : vector<1x256xi32>
    %c16_i32_4 = arith.constant 16 : i32
    %21 = vector.broadcast %c16_i32_4 : i32 to vector<1x256xi32>
    %22 = arith.cmpi sge, %0, %21 : vector<1x256xi32>
    %c240_i32 = arith.constant 240 : i32
    %23 = vector.broadcast %c240_i32 : i32 to vector<1x256xi32>
    %24 = arith.cmpi slt, %0, %23 : vector<1x256xi32>
    %c0 = arith.constant 0 : index
    %c0_5 = arith.constant 0 : index
    %c0_6 = arith.constant 0 : index
    %25 = vector.load %arg2[%c0, %c0_5, %c0_6] : memref<5x8x4xf32, #tpu.memory_space<vmem>>, vector<1x8x4xf32>
    %26 = vector.shape_cast %25 : vector<1x8x4xf32> to vector<8x4xf32>
    %c1 = arith.constant 1 : index
    %c0_7 = arith.constant 0 : index
    %c0_8 = arith.constant 0 : index
    %27 = vector.load %arg2[%c1, %c0_7, %c0_8] : memref<5x8x4xf32, #tpu.memory_space<vmem>>, vector<1x8x4xf32>
    %28 = vector.shape_cast %27 : vector<1x8x4xf32> to vector<8x4xf32>
    %c2 = arith.constant 2 : index
    %c0_9 = arith.constant 0 : index
    %c0_10 = arith.constant 0 : index
    %29 = vector.load %arg2[%c2, %c0_9, %c0_10] : memref<5x8x4xf32, #tpu.memory_space<vmem>>, vector<1x8x4xf32>
    %30 = vector.shape_cast %29 : vector<1x8x4xf32> to vector<8x4xf32>
    %c3 = arith.constant 3 : index
    %c0_11 = arith.constant 0 : index
    %c0_12 = arith.constant 0 : index
    %31 = vector.load %arg2[%c3, %c0_11, %c0_12] : memref<5x8x4xf32, #tpu.memory_space<vmem>>, vector<1x8x4xf32>
    %32 = vector.shape_cast %31 : vector<1x8x4xf32> to vector<8x4xf32>
    %c4 = arith.constant 4 : index
    %c0_13 = arith.constant 0 : index
    %c0_14 = arith.constant 0 : index
    %33 = vector.load %arg2[%c4, %c0_13, %c0_14] : memref<5x8x4xf32, #tpu.memory_space<vmem>>, vector<1x8x4xf32>
    %34 = vector.shape_cast %33 : vector<1x8x4xf32> to vector<8x4xf32>
    %c0_i32_15 = arith.constant 0 : i32
    %35 = arith.index_cast %c0_i32_15 : i32 to index
    %c0_16 = arith.constant 0 : index
    %c0_17 = arith.constant 0 : index
    %36 = vector.load %arg1[%35, %c0_16, %c0_17] : memref<1x4x256xf32, #tpu.memory_space<vmem>>, vector<1x4x256xf32>
    %37 = vector.shape_cast %36 : vector<1x4x256xf32> to vector<4x256xf32>
    %c16_i32_18 = arith.constant 16 : i32
    %38 = tpu.dynamic_rotate %37 by %c16_i32_18 dim 1 : vector<4x256xf32>, i32 -> vector<4x256xf32>
    %cst = arith.constant 0.000000e+00 : f32
    %39 = vector.shape_cast %22 : vector<1x256xi1> to vector<1x256xi1>
    %40 = vector.broadcast %39 : vector<1x256xi1> to vector<4x256xi1>
    %41 = vector.broadcast %cst : f32 to vector<4x256xf32>
    %42 = arith.select %40, %38, %41 : vector<4x256xi1>, vector<4x256xf32>
    %c1_i32_19 = arith.constant 1 : i32
    %43 = tpu.dynamic_rotate %37 by %c1_i32_19 dim 1 : vector<4x256xf32>, i32 -> vector<4x256xf32>
    %cst_20 = arith.constant 0.000000e+00 : f32
    %44 = vector.shape_cast %18 : vector<1x256xi1> to vector<1x256xi1>
    %45 = vector.broadcast %44 : vector<1x256xi1> to vector<4x256xi1>
    %46 = vector.broadcast %cst_20 : f32 to vector<4x256xf32>
    %47 = arith.select %45, %43, %46 : vector<4x256xi1>, vector<4x256xf32>
    %c255_i32 = arith.constant 255 : i32
    %48 = tpu.dynamic_rotate %37 by %c255_i32 dim 1 : vector<4x256xf32>, i32 -> vector<4x256xf32>
    %cst_21 = arith.constant 0.000000e+00 : f32
    %49 = vector.shape_cast %20 : vector<1x256xi1> to vector<1x256xi1>
    %50 = vector.broadcast %49 : vector<1x256xi1> to vector<4x256xi1>
    %51 = vector.broadcast %cst_21 : f32 to vector<4x256xf32>
    %52 = arith.select %50, %48, %51 : vector<4x256xi1>, vector<4x256xf32>
    %c240_i32_22 = arith.constant 240 : i32
    %53 = tpu.dynamic_rotate %37 by %c240_i32_22 dim 1 : vector<4x256xf32>, i32 -> vector<4x256xf32>
    %cst_23 = arith.constant 0.000000e+00 : f32
    %54 = vector.shape_cast %24 : vector<1x256xi1> to vector<1x256xi1>
    %55 = vector.broadcast %54 : vector<1x256xi1> to vector<4x256xi1>
    %56 = vector.broadcast %cst_23 : f32 to vector<4x256xf32>
    %57 = arith.select %55, %53, %56 : vector<4x256xi1>, vector<4x256xf32>
    %cst_24 = arith.constant dense<0.000000e+00> : vector<8x256xf32>
    %58 = tpu.matmul %30, %37, %cst_24 {dimension_numbers = #tpu.dot_dimension_numbers<[1], [0], [0], [1], [0, 0, 1, 1], [], []>} : vector<8x4xf32>, vector<4x256xf32>, vector<8x256xf32> -> vector<8x256xf32>
    %cst_25 = arith.constant dense<0.000000e+00> : vector<8x256xf32>
    %59 = tpu.matmul %26, %42, %cst_25 {dimension_numbers = #tpu.dot_dimension_numbers<[1], [0], [0], [1], [0, 0, 1, 1], [], []>} : vector<8x4xf32>, vector<4x256xf32>, vector<8x256xf32> -> vector<8x256xf32>
    %60 = arith.addf %58, %59 : vector<8x256xf32>
    %cst_26 = arith.constant dense<0.000000e+00> : vector<8x256xf32>
    %61 = tpu.matmul %28, %47, %cst_26 {dimension_numbers = #tpu.dot_dimension_numbers<[1], [0], [0], [1], [0, 0, 1, 1], [], []>} : vector<8x4xf32>, vector<4x256xf32>, vector<8x256xf32> -> vector<8x256xf32>
    %62 = arith.addf %60, %61 : vector<8x256xf32>
    %cst_27 = arith.constant dense<0.000000e+00> : vector<8x256xf32>
    %63 = tpu.matmul %32, %52, %cst_27 {dimension_numbers = #tpu.dot_dimension_numbers<[1], [0], [0], [1], [0, 0, 1, 1], [], []>} : vector<8x4xf32>, vector<4x256xf32>, vector<8x256xf32> -> vector<8x256xf32>
    %64 = arith.addf %62, %63 : vector<8x256xf32>
    %cst_28 = arith.constant dense<0.000000e+00> : vector<8x256xf32>
    %65 = tpu.matmul %34, %57, %cst_28 {dimension_numbers = #tpu.dot_dimension_numbers<[1], [0], [0], [1], [0, 0, 1, 1], [], []>} : vector<8x4xf32>, vector<4x256xf32>, vector<8x256xf32> -> vector<8x256xf32>
    %66 = arith.addf %64, %65 : vector<8x256xf32>
    %67 = arith.index_cast %c0_i32_15 : i32 to index
    %c0_29 = arith.constant 0 : index
    %c0_30 = arith.constant 0 : index
    %68 = vector.load %arg3[%67, %c0_29, %c0_30] : memref<1x8x256xf32, #tpu.memory_space<vmem>>, vector<1x8x256xf32>
    %69 = vector.shape_cast %68 : vector<1x8x256xf32> to vector<8x256xf32>
    %70 = vector.shape_cast %66 : vector<8x256xf32> to vector<1x8x256xf32>
    tpu.vector_store %arg3[%67, %c0_29, %c0_30], %70 {strides = array<i32>} : memref<1x8x256xf32, #tpu.memory_space<vmem>>, vector<1x8x256xf32>,
    %c1_i32_31 = arith.constant 1 : i32
    return
  }
  func.func @transform_0(%arg0: i32) -> (i32, i32, i32) {
    %c0_i32 = arith.constant 0 : i32
    %c0_i32_0 = arith.constant 0 : i32
    %c0_i32_1 = arith.constant 0 : i32
    return %arg0, %c0_i32, %c0_i32_0 : i32, i32, i32
  }
  func.func @transform_1(%arg0: i32) -> (i32, i32, i32) {
    %c0_i32 = arith.constant 0 : i32
    %c0_i32_0 = arith.constant 0 : i32
    %c0_i32_1 = arith.constant 0 : i32
    %c0_i32_2 = arith.constant 0 : i32
    return %c0_i32, %c0_i32_0, %c0_i32_1 : i32, i32, i32
  }
  func.func @transform_2(%arg0: i32) -> (i32, i32, i32) {
    %c0_i32 = arith.constant 0 : i32
    %c0_i32_0 = arith.constant 0 : i32
    %c0_i32_1 = arith.constant 0 : i32
    return %arg0, %c0_i32, %c0_i32_0 : i32, i32, i32
  }
}

</mosaic_0001>

<bundles_post_ra>
// kernel: tpu_custom_call.1
= control target key start
LH: loop header
LB: loop body
LE: loop exit
PB: predicated region body
PF: predicated region fallthrough
CT: control target
= control target key end

     0   :  { %7 = vsyncpa [#allocation3], 0  ;;  %s1065_s0 = inlined_call_operand.vmem [shape: f32[2,4,256], index: 0, kind: input, shape index: {}]   ;;  %s1066_s1 = inlined_call_operand.vmem [shape: f32[5,8,4], index: 1, kind: input, shape index: {}]   ;;  %s1067_s2 = inlined_call_operand.hbm [shape: f32[2,8,256], index: 2, kind: output, shape index: {}]  }
   0x1   :  { %9 = vsyncpa [#allocation3 + $0x1], 0  ;;  %s895_s9 = smov 0   ;;  %s897_s10 = smov 0  }
   0x2   :  { %s899_s11 = smov 0   ;;  %s901_s12 = smov 0  }
   0x3 LB: > { %s916_s13 = sadd.s32 4294967295, %s872_s12   ;;  %s724_s14 = sadd.s32 4294967294, %s872_s12   ;;  %s872_s12 = sphi %s901_s12, %s1081_s12   ;;  %s868_s11 = sphi %s899_s11, %s1080_s11   ;;  %s864_s10 = sphi %s897_s10, %s1079_s10   ;;  %s860_s9 = sphi %s895_s9, %s1078_s9  }
   0x4   : > { %s920_s15 = sadd.s32 1, %s872_s12   ;;  %s69_s16 = sadd.s32 1, %s868_s11 }
   0x5   : > { %s66_s17 = ssub.s32 %s872_s12, %s920_s15  ;;  %p79_p0 = scmp.ne.s32.totalorder %s868_s11, %s864_s10 }
   0x6   : > { %p67_p1 = scmp.eq.s32.totalorder %s66_s17, 0  ;;  %p80_p2 = scmp.eq.s32.totalorder %s916_s13, 1 }
   0x7   : > { %p85_p3 = scmp.ne.s32.totalorder %s864_s10, %s860_s9  ;;  %p86_p4 = scmp.eq.s32.totalorder %s724_s14, 1 }
   0x8   : > { %s931_s18 = scalar_select %p67_p1, %s868_s11, %s69_s16  }
   0x9   : > { %p933_p5 = por %p80_p2, %p79_p0  ;;  %p937_p6 = por %p86_p4, %p85_p3 }
   0xa   : > { %p727_p7 = scmp.ge.s32.totalorder %s872_s12, 1  ;;  %p115_p8 = scmp.lt.s32.totalorder %s872_s12, 3 }
   0xc   : > { %p116_p9 = pnand %p727_p7, %p115_p8 }
   0xd   : > { %p137_p10 = scmp.lt.s32.totalorder (!%p116_p9), %s916_s13, 1  ;;  %v874_v0 = vmov (!%p116_p9), 0.0   ;;  %s875_s26 = smov (!%p116_p9), 127   ;;  %v142_v3 = vlaneseq (!%p116_p9)  ;;  %vm246_vm5 = vcmask (!%p116_p9), 1043456   ;;  %vm242_vm7 = vcmask (!%p116_p9), 31744   ;;  %v731_v23 = vld [vmem:[%s1066_s1 + $0x8] sm:$0xff] (!%p116_p9) }
   0xe   : > { %119 = sbr.rel (%p116_p9) target bundleno = 394 (0x18a), region = 28  ;;  %475 = vmatprep.mubr.f32.mxu0 (!%p116_p9), %v874_v0  ;;  %317 = vmatprep.mubr.f32.mxu1 (!%p116_p9), %v874_v0  ;;  %s876_s27 = smov (!%p116_p9), 1   ;;  %v177_v29 = vld [vmem:[%s1066_s1] sm:$0xff] (!%p116_p9)  ;;  %v733_v35 = vld [vmem:[%s1066_s1 + $0x18] sm:$0xff] (!%p116_p9)  ;;  %v732_v37 = vld [vmem:[%s1066_s1 + $0x10] sm:$0xff] (!%p116_p9) }
   0xf   : > { %s877_s28 = smov (!%p116_p9), 16   ;;  %s878_s29 = smov (!%p116_p9), 112   ;;  %v143_v4 = vand.u32 (!%p116_p9), 127, %v142_v3  ;;  %v734_v38 = vld [vmem:[%s1066_s1 + $0x20] sm:$0xff] (!%p116_p9) }
  0x10   : > { %s756_s23 = sshll.u32 (!%p116_p9), %s916_s13, 8  ;;  %s879_s30 = smov (!%p116_p9), [#allocation2]  }
  0x11   : > { %v144_v5 = vadd.s32 (!%p116_p9), 128, %v143_v4  ;;  %v149_v6 = vand.u32 (!%p116_p9), 15, %v143_v4  ;;  %vm220_vm0 = vcmp.lt.s32.totalorder (!%p116_p9), %v143_v4, 127  ;;  %vm207_vm1 = vcmp.lt.s32.totalorder (!%p116_p9), %v143_v4, 1  ;;  %s814_s3 = sshll.u32 (!%p116_p9), %s879_s30, 4  ;;  %s815_s3 = int_to_ptr.vmem [resolvable:$false] %s814_s3 }
  0x12   : > { %vm194_vm6 = vcmp.lt.s32.totalorder (!%p116_p9), %v143_v4, 16  ;;  %vm173_vm9 = vcmp.ge.s32.totalorder (!%p116_p9), %v143_v4, 16  ;;  %vm233_vm10 = vcmp.lt.s32.totalorder (!%p116_p9), %v143_v4, 112  ;;  %s816_s4 = scalar_lea.vmem (!%p116_p9), %s815_s3, 512 }
  0x13   : > { %v156_v7 = vand.u32 (!%p116_p9), 15, %v144_v5  ;;  %vm966_vm4 = vcmp.ne.s32.totalorder (!%p116_p9), %v149_v6, 0  ;;  %vm970_vm8 = vcmp.ne.s32.totalorder (!%p116_p9), %v149_v6, 15  ;;  %vm176_vm11 = vcmp.lt.s32.totalorder (!%p116_p9), %v144_v5, 240 }
  0x15   : > { %s138_s21 = scalar_select %p137_p10, %s916_s13, 1  ;;  %vm958_vm2 = vcmp.ne.s32.totalorder %v156_v7, 15  ;;  %vm962_vm3 = vcmp.ne.s32.totalorder %v156_v7, 0 }
  0x17   : > { %s755_s22 = sshll.u32 %s138_s21, 3  ;;  %s134_s21 = sand.u32 1, %s864_s10  }
  0x18   : > { %s141_s25 = scalar_lea.vmem %s1065_s0, %s755_s22  ;;  %s728_s22 = sshll.u32 %s134_s21, 4 }
  0x19   : > { %v950_v1 = vld [vmem:[%s141_s25] sm:$0xff]  ;;  %s136_s24 = scalar_lea.vmem [#allocation2], %s728_s22 }
  0x1a   : > { %216 = vrot.lane.b32.xlu1 %v950_v1, %s875_s26  ;;  %203 = vrot.lane.b32.xlu0 %v950_v1, %s876_s27  ;;  %v188_v2 = vcombine.high %v950_v1, %v950_v1  ;;  %s665_s25 = sshll.u32 %s136_s24, 4  ;;  %s1025_s25 = int_to_ptr.vmem [resolvable:$true] %s665_s25 }
  0x1b   : > { %s810_s13 = scalar_lea.vmem %s1025_s25, 256  ;;  %p817_p0 = scmp.lt.s32.totalorder %s1025_s25, %s815_s3 }
  0x1c   : > { %p811_p11 = scmp.ne.s32.totalorder %s1025_s25, %s810_s13  ;;  %p818_p1 = scmp.lt.s32.totalorder %s816_s4, %s810_s13 }
  0x1e   : > { %218 = vrot.lane.b32.xlu1 %v188_v2, %s875_s26  ;;  %205 = vrot.lane.b32.xlu0 %v188_v2, %s876_s27  ;;  %p812_p12 = pnand %p811_p11, %p933_p5  ;;  %p819_p2 = por %p818_p1, %p817_p0 }
  0x20   : > { %p813_p13 = pneg %p812_p12 }
  0x22   : > { %192 = vrot.lane.b32.xlu1 %v188_v2, %s877_s28  ;;  %190 = vrot.lane.b32.xlu0 %v950_v1, %s877_s28  ;;  %s1023_s28 = scalar_lea.hbm %s1067_s2, %s756_s23  ;;  %p820_p3 = pnand %p819_p2, %p813_p13 }
  0x26   : > { %231 = vrot.lane.b32.xlu1 %v188_v2, %s878_s29  ;;  %229 = vrot.lane.b32.xlu0 %v950_v1, %s878_s29  ;;  %s651_s29 = scalar_lea.sflag [#allocation3], %s134_s21 }
  0x8c   : > { %v217_v8 = vpop.permute.xlu1 %216  ;;  %v204_v9 = vpop.permute.xlu0 %203 }
  0x90   : > { %v219_v13 = vpop.permute.xlu1 %218  ;;  %v206_v14 = vpop.permute.xlu0 %205 }
  0x91   : > { %v222_v16 = vsel %vm220_vm0, %v219_v13, %v217_v8  ;;  %v209_v17 = vsel %vm207_vm1, %v206_v14, %v204_v9  ;;  %v208_v18 = vsel %vm207_vm1, %v204_v9, %v206_v14  ;;  %v221_v19 = vsel %vm220_vm0, %v217_v8, %v219_v13 }
  0x92   : > { %v228_v20 = vsel %vm958_vm2, %v222_v16, 0.0  ;;  %v215_v21 = vsel %vm962_vm3, %v208_v18, 0.0  ;;  %v214_v22 = vsel %vm966_vm4, %v209_v17, 0.0  ;;  %v227_v26 = vsel %vm970_vm8, %v221_v19, 0.0 }
  0x93   : > { %741 = vmatprep.subr.msk.mxu0 %vm246_vm5, %v215_v21 }
  0x94   : > { %v193_v24 = vpop.permute.xlu1 %192  ;;  %742 = vmatpush1.msk.msra.mxu0 %vm246_vm5, %v214_v22  ;;  %v191_v25 = vpop.permute.xlu0 %190 }
  0x95   : > { %v196_v27 = vsel %vm194_vm6, %v193_v24, %v191_v25  ;;  %743 = vmatmul.mubr.msk.f32.vlgmr.msra.gmra.mrb[0].mxu0 %vm242_vm7, %v731_v23  ;;  %744 = vmatprep.subr.msk.mxu0 %vm246_vm5, %v228_v20  ;;  %v195_v28 = vsel %vm194_vm6, %v191_v25, %v193_v24 }
  0x96   : > { %735 = vmatprep.subr.msk.mxu1 %vm246_vm5, %v195_v28  ;;  %745 = vmatpush1.msk.msra.mxu0 %vm246_vm5, %v227_v26  ;;  %v201_v30 = vsel %vm173_vm9, %v196_v27, 0.0 }
  0x97   : > { %736 = vmatpush1.msk.msra.mxu1 %vm246_vm5, %v201_v30  ;;  %557 = vmatprep.mubr.f32.mxu0 %v874_v0 }
  0x98   : > { %737 = vmatmul.mubr.msk.f32.vlgmr.msra.gmra.mrb[0].mxu1 %vm242_vm7, %v177_v29  ;;  %v232_v31 = vpop.permute.xlu1 %231  ;;  %v230_v32 = vpop.permute.xlu0 %229  ;;  %738 = vmatprep.subr.msk.mxu1 %vm246_vm5, %v188_v2 }
  0x99   : > { %v235_v33 = vsel %vm233_vm10, %v232_v31, %v230_v32  ;;  %739 = vmatpush1.msk.msra.mxu1 %vm246_vm5, %v950_v1  ;;  %395 = vmatprep.mubr.f32.mxu1 %v874_v0  ;;  %v234_v36 = vsel %vm233_vm10, %v230_v32, %v232_v31 }
  0x9a   : > { %v241_v34 = vsel %vm176_vm11, %v235_v33, 0.0 }
  0x9b   : > { %747 = vmatprep.subr.msk.mxu0 %vm246_vm5, %v241_v34 }
  0x9d   : > { %746 = vmatmul.mubr.msk.f32.vlgmr.msra.gmra.mrb[0].mxu0 %vm242_vm7, %v733_v35 }
  0x9e   : > { %748 = vmatpush1.msk.msra.mxu0 %vm246_vm5, %v234_v36  ;;  %639 = vmatprep.mubr.f32.mxu0 %v874_v0 }
  0xa0   : > { %740 = vmatmul.mubr.msk.f32.vlgmr.msra.gmra.mrb[0].mxu1 %vm242_vm7, %v732_v37 }
  0xa5   : > { %749 = vmatmul.mubr.msk.f32.vlgmr.msra.gmra.mrb[0].mxu0 %vm242_vm7, %v734_v38 }
 0x173   : > { %v397_v39 = vpop.f32.mrb[0].mxu1 }
 0x174   : > { %v399_v40 = vpop.f32.mrb[1].mxu1 }
 0x178   : > { %v641_v41 = vpop.f32.mrb[0].mxu0 }
 0x179   : > { %v757_v42 = vadd.f32 %v641_v41, %v397_v39  ;;  %v643_v43 = vpop.f32.mrb[1].mxu0 }
 0x17a   : > { %v758_v44 = vadd.f32 %v643_v43, %v399_v40 }
 0x17b   : > { %648 = vst [vmem:[%s136_s24] sm:$0xff] %v757_v42 }
 0x17c   : > { %649 = vst [vmem:[%s136_s24 + $0x8] sm:$0xff] %v758_v44 }
 0x17d   : > { %823 = shalt.err (!%p820_p3)
}
 0x17e   : > { %s824_s5 = scalar_lea.hbm %s1023_s28, 256  ;;  %s828_s8 = scalar_lea.hbm %s1067_s2, 512 }
 0x17f   : > { %p825_p4 = scmp.ne.s32.totalorder %s1023_s28, %s824_s5  ;;  %p829_p9 = scmp.lt.u32.totalorder %s1023_s28, %s1067_s2 }
 0x180   : > { %p830_p10 = scmp.lt.u32.totalorder %s828_s8, %s824_s5  ;;  %p832_p12 = scmp.lt.u32.totalorder %s824_s5, %s1023_s28 }
 0x181   : > { %p826_p7 = pnand %p825_p4, %p933_p5 }
 0x182   : > { %p831_p11 = por %p830_p10, %p829_p9 }
 0x183   : > { %p827_p8 = pneg %p826_p7 }
 0x184   : > { %p833_p13 = por %p832_p12, %p831_p11 }
 0x186   : > { %p834_p0 = pnand %p833_p13, %p827_p8 }
 0x188   : > { %837 = shalt.err (!%p834_p0)
}
 0x189   : > { %765 = dma.vmem_to_hbm [thread:$0]  (%p933_p5), %s1025_s25, 256, %s1023_s28, %s651_s29  }
 0x18a PF: > { %p771_p1 = scmp.ge.s32.totalorder %s872_s12, 2  ;;  %s677_s17 = sand.u32 1, %s860_s9  }
 0x18b   : > { %s678_s21 = scalar_lea.sflag [#allocation3], %s677_s17 }
 0x18c   : > { %p768_p2 = pnand %p771_p1, %p937_p6 }
 0x18e   : > { %855 = dma.done.wait (!%p768_p2), %s678_s21, 256  }
 0x18f   : > { %857 = vsyncadd (!%p768_p2), %s678_s21, 4294967040  ;;  %p12_p3 = scmp.ge.s32.totalorder %s920_s15, 4   ;;  %s1078_s9 = smov %s864_s10 }
 0x190   : > { %s1079_s10 = smov %s868_s11  ;;  %s1080_s11 = smov %s931_s18 }
 0x191   : > { %s1081_s12 = smov %s920_s15  ;;  %14 = sbr.rel (!%p12_p3) target bundleno = 3 (0x3), region = 67 }
 0x198   :  { %683 = vsyncpa [#allocation3], 1 }
 0x199   :  { %685 = vsyncpa [#allocation3 + $0x1], 1 }

</bundles_post_ra>
